<compile_context>
chip_gen: v6e
topology: v6e:2x2x1
jax: 0.10.0
libtpu: 0.0.40
codegen_flags: <defaults>
</compile_context>

<pallas_src>
import functools

import jax
import jax.numpy as jnp
from jax.experimental import pallas as pl
from jax.experimental.pallas import tpu as pltpu


def _round_down(x, m):
    return (x // m) * m


def _target_tile_bytes():
    """Per-generation x-tile byte budget (HBM-bound: bigger where HBM is faster)."""
    kind = ""
    try:
        kind = jax.devices()[0].device_kind.lower()
    except Exception:
        pass
    if "v7" in kind or "7x" in kind:
        return 8 << 20   # ~3.2 TB/s per TC: amortize the ~0.35 us/step overhead
    if "v6" in kind:
        return 4 << 20   # ~1.4 TB/s: 2-4 MiB already sits at ~85% of roofline
    return 2 << 20       # v5e / unknown: fits the 16 MiB default scoped VMEM


def _select_tiles(rows, cols, itemsize, target_bytes):
    """Pick (tm, tn) with tm*tn*itemsize ~= target_bytes and legal TPU blocks.

    tm is a multiple of the sublane packing (8/f32, 16/bf16) or the full row
    extent; tn is a multiple of 128 or the full column extent.
    """
    sublane = max(8, 32 // itemsize)
    budget = max(target_bytes, sublane * 128 * itemsize)
    budget_elems = budget // itemsize

    # Whole slab fits one block: single grid step, no boundary masking.
    # (Also covers sub-128-lane feature maps at small batch.)
    if rows * cols <= budget_elems:
        return rows, cols

    # Lane (fast) dim.
    if cols <= 128:
        tn = cols                      # full extent (tiny feature maps)
    else:
        min_tm = min(rows, sublane)
        if cols * min_tm <= budget_elems:
            tn = cols                  # full columns: no lane-boundary blocks
        else:
            tn = max(128, _round_down(budget_elems // min_tm, 128))
            tn = min(tn, _round_down(cols, 128))

    # Sublane (slow) dim: fill the remaining byte budget.
    tm = budget_elems // tn
    if tm >= rows:
        tm = rows
    else:
        tm = max(sublane, _round_down(tm, sublane))
    return tm, tn


def _fused_leaky_relu_kernel(x_ref, b_ref, o_ref, *, pos_scale, neg_scale):
    # x_ref: (tm, tn) tile; b_ref: (tm, 1) per-row f32 bias (lane broadcast).
    xb = x_ref[...].astype(jnp.float32) + b_ref[...]
    o_ref[...] = jnp.where(xb >= 0, xb * pos_scale, xb * neg_scale).astype(o_ref.dtype)


def fused_leaky_relu(x, bias, negative_slope=0.2, scale=2 ** 0.5, tile_bytes=None):
    """x: (N, C, H, W) float array, bias: (C,) float array."""
    N, C, H, W = x.shape
    assert bias.shape == (C,)

    rows, cols = N * C, H * W
    itemsize = jnp.dtype(x.dtype).itemsize

    # Glue: flatten spatial dims; one f32 bias scalar per (n, c) row.
    x2d = x.reshape(rows, cols)
    b2d = jnp.tile(bias.astype(jnp.float32), (N,)).reshape(rows, 1)

    if tile_bytes is None:
        tile_bytes = _target_tile_bytes()
    tm, tn = _select_tiles(rows, cols, itemsize, tile_bytes)
    grid = (pl.cdiv(rows, tm), pl.cdiv(cols, tn))

    # Double-buffered x + out tiles, bias column (lanes pad to 128), margin.
    tile_in_bytes = tm * tn * itemsize
    bias_tile_bytes = tm * 128 * 4
    vmem_limit = int(min(
        48 << 20,
        max(16 << 20, 4 * tile_in_bytes + 2 * bias_tile_bytes + (4 << 20)),
    ))

    kernel = functools.partial(
        _fused_leaky_relu_kernel,
        pos_scale=float(scale),
        neg_scale=float(negative_slope * scale),
    )

    # NOTE: input_output_aliases={0: 0} would drop the separate output
    # allocation, but it is only a free win when x is actually donated at the
    # jit boundary; omitted so the eager / non-donated path never pays a
    # defensive copy (and never aliases over a caller-visible buffer).
    out2d = pl.pallas_call(
        kernel,
        out_shape=jax.ShapeDtypeStruct((rows, cols), x.dtype),
        grid_spec=pltpu.PrefetchScalarGridSpec(
            num_scalar_prefetch=0,
            grid=grid,
            in_specs=[
                pl.BlockSpec((tm, tn), lambda i, j: (i, j)),
                pl.BlockSpec((tm, 1), lambda i, j: (i, 0)),
            ],
            out_specs=pl.BlockSpec((tm, tn), lambda i, j: (i, j)),
        ),
        compiler_params=pltpu.CompilerParams(
            dimension_semantics=("parallel", "parallel"),
            vmem_limit_bytes=vmem_limit,
        ),
        cost_estimate=pl.CostEstimate(
            flops=4 * rows * cols,
            transcendentals=0,
            bytes_accessed=2 * rows * cols * itemsize + rows * 4,
        ),
    )(x2d, b2d)

    return out2d.reshape(N, C, H, W)


class FusedLeakyReLU:
    """JAX mirror of the PyTorch module (bias initialized to zeros)."""

    def __init__(self, channel, negative_slope=0.2, scale=2 ** 0.5):
        self.bias = jnp.zeros((channel,), dtype=jnp.float32)
        self.negative_slope = negative_slope
        self.scale = scale

    def __call__(self, x):
        return fused_leaky_relu(x, self.bias, self.negative_slope, self.scale)


def _reference(x, bias, negative_slope=0.2, scale=2 ** 0.5):
    xb = x.astype(jnp.float32) + bias.astype(jnp.float32).reshape(1, -1, 1, 1)
    return jnp.where(xb >= 0, xb, xb * negative_slope) * scale


if __name__ == "__main__":
    key = jax.random.PRNGKey(0)
    kx, kb, kx2 = jax.random.split(key, 3)

    # Case 1: canonical small NCHW shape (single whole-array block path).
    N, C, H, W = 2, 4, 16, 16
    x = jax.random.normal(kx, (N, C, H, W), dtype=jnp.float32)
    module = FusedLeakyReLU(C)
    # Nonzero bias so the bias-add path is actually exercised.
    module.bias = jax.random.normal(kb, (C,), dtype=jnp.float32)

    out = jax.block_until_ready(module(x))
    ref = _reference(x, module.bias)
    assert out.shape == (N, C, H, W)
    assert jnp.allclose(out, ref, atol=1e-6, rtol=1e-6)

    # Case 2: skewed shape with a tiny forced tile budget to exercise the
    # multi-step grid, boundary masking and the (tm, 1) bias broadcast.
    x2 = jax.random.normal(kx2, (1, 3, 40, 40), dtype=jnp.float32)
    b2 = jax.random.normal(kb, (3,), dtype=jnp.float32)
    out2 = jax.block_until_ready(fused_leaky_relu(x2, b2, tile_bytes=8 << 10))
    ref2 = _reference(x2, b2)
    assert jnp.allclose(out2, ref2, atol=1e-6, rtol=1e-6)

    # Case 3: bf16 input, f32 in-kernel compute, bf16 store.
    xb16 = x.astype(jnp.bfloat16)
    out3 = jax.block_until_ready(fused_leaky_relu(xb16, module.bias))
    ref3 = _reference(xb16, module.bias).astype(jnp.bfloat16).astype(jnp.float32)
    assert jnp.allclose(out3.astype(jnp.float32), ref3, atol=1e-2, rtol=1e-2)

    print("KERNEL_OK")
</pallas_src>

<mosaic_0001>
module attributes {stable_mosaic.version = 11 : i64} {
  func.func @_fused_leaky_relu_kernel(%arg0: i32, %arg1: i32, %arg2: memref<8x256xf32, #tpu.memory_space<vmem>>, %arg3: memref<8x1xf32, #tpu.memory_space<vmem>>, %arg4: memref<8x256xf32, #tpu.memory_space<vmem>>) attributes {dimension_semantics = [#tpu.dimension_semantics<parallel>, #tpu.dimension_semantics<parallel>], iteration_bounds = array<i64: 1, 1>, scalar_prefetch = 0 : i64, scratch_operands = 0 : i64, tpu.core_type = #tpu.core_type<tc>, window_params = [{transform_indices = @transform_0, window_bounds = array<i64: 8, 256>}, {transform_indices = @transform_1, window_bounds = array<i64: 8, 1>}, {transform_indices = @transform_2, window_bounds = array<i64: 8, 256>}]} {
    %c0 = arith.constant 0 : index
    %c0_0 = arith.constant 0 : index
    %0 = vector.load %arg2[%c0, %c0_0] : memref<8x256xf32, #tpu.memory_space<vmem>>, vector<8x256xf32>
    %c0_1 = arith.constant 0 : index
    %c0_2 = arith.constant 0 : index
    %1 = vector.load %arg3[%c0_1, %c0_2] : memref<8x1xf32, #tpu.memory_space<vmem>>, vector<8x1xf32>
    %2 = vector.broadcast %1 : vector<8x1xf32> to vector<8x256xf32>
    %3 = arith.addf %0, %2 : vector<8x256xf32>
    %cst = arith.constant 0.000000e+00 : f32
    %4 = vector.broadcast %cst : f32 to vector<8x256xf32>
    %5 = arith.cmpf oge, %3, %4 : vector<8x256xf32>
    %cst_3 = arith.constant 1.41421354 : f32
    %6 = vector.broadcast %cst_3 : f32 to vector<8x256xf32>
    %7 = arith.mulf %3, %6 : vector<8x256xf32>
    %cst_4 = arith.constant 0.282842726 : f32
    %8 = vector.broadcast %cst_4 : f32 to vector<8x256xf32>
    %9 = arith.mulf %3, %8 : vector<8x256xf32>
    %10 = arith.select %5, %7, %9 : vector<8x256xi1>, vector<8x256xf32>
    %c0_5 = arith.constant 0 : index
    %c0_6 = arith.constant 0 : index
    %11 = vector.load %arg4[%c0_5, %c0_6] : memref<8x256xf32, #tpu.memory_space<vmem>>, vector<8x256xf32>
    tpu.vector_store %arg4[%c0_5, %c0_6], %10 {strides = array<i32>} : memref<8x256xf32, #tpu.memory_space<vmem>>, vector<8x256xf32>,
    return
  }
  func.func @transform_0(%arg0: i32, %arg1: i32) -> (i32, i32) {
    %c0_i32 = arith.constant 0 : i32
    return %arg0, %arg1 : i32, i32
  }
  func.func @transform_1(%arg0: i32, %arg1: i32) -> (i32, i32) {
    %c0_i32 = arith.constant 0 : i32
    %c0_i32_0 = arith.constant 0 : i32
    return %arg0, %c0_i32 : i32, i32
  }
  func.func @transform_2(%arg0: i32, %arg1: i32) -> (i32, i32) {
    %c0_i32 = arith.constant 0 : i32
    return %arg0, %arg1 : i32, i32
  }
}

</mosaic_0001>

<bundles_post_ra>
// kernel: tpu_custom_call.1
= control target key start
LH: loop header
LB: loop body
LE: loop exit
PB: predicated region body
PF: predicated region fallthrough
CT: control target
= control target key end

     0   :  { %7 = vsyncpa [#allocation3], 0  ;;  %s134_s0 = inlined_call_operand.hbm [shape: f32[8,256], index: 0, kind: input, shape index: {}]   ;;  %s135_s1 = inlined_call_operand.vmem [shape: f32[8,1], index: 1, kind: input, shape index: {}]   ;;  %s136_s2 = inlined_call_operand.hbm [shape: f32[8,256], index: 2, kind: output, shape index: {}]  }
   0x1   :  { %8 = vsyncpa [#allocation4], 0  ;;  %s107_s9 = smov [#allocation2]  }
   0x2   :  { %s15_s10 = sshll.u32 %s107_s9, 4  ;;  %s16_s10 = int_to_ptr.vmem [resolvable:$true] %s15_s10 }
   0x3   :  { %s71_s11 = scalar_lea.vmem %s16_s10, 256  ;;  %p76_p1 = scmp.lt.s32.totalorder %s16_s10, %s16_s10 }
   0x4   :  { %p72_p0 = scmp.ne.s32.totalorder %s16_s10, %s71_s11  ;;  %p77_p2 = scmp.lt.s32.totalorder %s71_s11, %s71_s11 }
   0x6   :  { %p78_p3 = por %p77_p2, %p76_p1 }
   0x8   :  { %p79_p4 = pnand %p78_p3, %p72_p0 }
   0xa   :  { %82 = shalt.err (!%p79_p4)
}
   0xb   :  { %18 = dma.hbm_to_vmem [thread:$0]  %s134_s0, 256, %s16_s10, [#allocation3]  }
   0xc   :  { %103 = dma.done.wait [#allocation3], 256  }
   0xd   :  { %104 = vsyncadd [#allocation3], 4294967040  ;;  %v108_v0 = vmov 0   ;;  %v26_v1 = vld [vmem:[%s135_s1] sm:$0xff]  ;;  %v25_v3 = vld [vmem:[#allocation2 + $0x8] sm:$0xff]  ;;  %s109_s16 = smov [#allocation5]  }
   0xe   :  { %62 = vset.pattern.permute.xlu0 %v108_v0  ;;  %v24_v2 = vld [vmem:[#allocation2] sm:$0xff]  ;;  %s50_s17 = sshll.u32 %s109_s16, 4  ;;  %s51_s17 = int_to_ptr.vmem [resolvable:$true] %s50_s17 }
   0xf   :  { %29 = vperm.xlu0 %62, %v26_v1   ;;  %s83_s0 = scalar_lea.vmem %s51_s17, 256  ;;  %p88_p6 = scmp.lt.s32.totalorder %s51_s17, %s51_s17 }
  0x10   :  { %p84_p5 = scmp.ne.s32.totalorder %s51_s17, %s83_s0  ;;  %p89_p7 = scmp.lt.s32.totalorder %s83_s0, %s83_s0 }
  0x12   :  { %p90_p8 = por %p89_p7, %p88_p6 }
  0x14   :  { %p91_p9 = pnand %p90_p8, %p84_p5 }
  0x8a   :  { %v30_v4 = vpop.permute.xlu0 %29 }
  0x8b   :  { %v32_v5 = vadd.f32 %v30_v4, %v24_v2  ;;  %v33_v6 = vadd.f32 %v30_v4, %v25_v3 }
  0x8d   :  { %vm34_vm0 = vcmp.ge.f32.partialorder %v32_v5, 0.0  ;;  %vm35_vm1 = vcmp.ge.f32.partialorder %v33_v6, 0.0  ;;  %v36_v7 = vmul.f32 1.4142135, %v32_v5  ;;  %v37_v8 = vmul.f32 1.4142135, %v33_v6 }
  0x8e   :  { %v38_v9 = vmul.f32 0.28284273, %v32_v5  ;;  %v39_v10 = vmul.f32 0.28284273, %v33_v6 }
  0x90   :  { %v40_v11 = vsel %vm34_vm0, %v36_v7, %v38_v9  ;;  %v41_v12 = vsel %vm35_vm1, %v37_v8, %v39_v10 }
  0x91   :  { %42 = vst [vmem:[#allocation5] sm:$0xff] %v40_v11  ;;  %43 = vst [vmem:[#allocation5 + $0x8] sm:$0xff] %v41_v12 }
  0x92   :  { %94 = shalt.err (!%p91_p9)
}
  0x93   :  { %53 = dma.vmem_to_hbm [thread:$0]  %s51_s17, 256, %s136_s2, [#allocation4]  }
  0x94   :  { %105 = dma.done.wait [#allocation4], 256  }
  0x95   :  { %106 = vsyncadd [#allocation4], 4294967040 }
  0x96   :  { %57 = vsyncpa [#allocation3], 1 }
  0x97   :  { %58 = vsyncpa [#allocation4], 1 }

</bundles_post_ra>
